<compile_context>
chip_gen: v5e
topology: v5e:2x2
jax: 0.10.0
libtpu: 0.0.40
codegen_flags: <defaults>
</compile_context>

<pallas_src>
import jax
import jax.numpy as jnp
from jax.experimental import pallas as pl
from jax.experimental.pallas import tpu as pltpu


def _round_up(n, m):
    return ((n + m - 1) // m) * m


# ---------------------------------------------------------------------------
# Pallas kernel
# ---------------------------------------------------------------------------
def _make_film_kernel(num_linear):
    """Fused kernel: num_linear x (Linear + ReLU) then one fused gamma|beta head.

    Ref order (all VMEM):
      x, [W0, b0], ..., [W_{L-1}, b_{L-1}], W_head, b_head, out
    Weights/activations are bf16 (f32 accumulation); biases f32; output bf16.
    BatchNorm (eval) is pre-folded into the weights, Dropout (eval) is identity.
    """

    def kernel(*refs):
        h = refs[0][...]                       # bf16 activation, lanes = in_dim
        idx = 1
        for _ in range(num_linear):
            w = refs[idx][...]                 # bf16
            b = refs[idx + 1][...]             # f32
            idx += 2
            # Linear (MXU, f32 accum) + bias + ReLU (VPU), back to bf16.
            acc = jnp.dot(h, w, preferred_element_type=jnp.float32)
            h = jnp.maximum(acc + b, 0.0).astype(jnp.bfloat16)
        w_head = refs[idx][...]
        b_head = refs[idx + 1][...]
        out_ref = refs[idx + 2]
        # Fused gamma|beta head: one MXU matmul, one lane-dense bf16 store.
        out_ref[...] = (jnp.dot(h, w_head, preferred_element_type=jnp.float32)
                        + b_head).astype(out_ref.dtype)

    return kernel


# ---------------------------------------------------------------------------
# Parameter construction (deterministic, synthetic) — mirrors the PyTorch init
# ---------------------------------------------------------------------------
def init_params(key, input_dim, num_layer, n_target_blocks, num_unit, scale=2):
    """dense_control_block.__init__ (scale_type='exp') + film heads."""
    dims = [input_dim * scale ** i for i in range(num_layer)]
    last_dim = dims[-1]

    params = {"layers": []}
    for i, (fin, fout) in enumerate(zip(dims[:-1], dims[1:])):
        key, kw, kb = jax.random.split(key, 3)
        bound = 1.0 / (fin ** 0.5)
        w = jax.random.uniform(kw, (fout, fin), jnp.float32, -bound, bound)
        b = jax.random.uniform(kb, (fout,), jnp.float32, -bound, bound)
        layer = {"w": w, "b": b}
        if i != 0:
            key, km, kv = jax.random.split(key, 3)
            layer["bn_weight"] = jnp.ones((fout,), jnp.float32)
            layer["bn_bias"] = jnp.zeros((fout,), jnp.float32)
            layer["bn_mean"] = 0.1 * jax.random.normal(km, (fout,), jnp.float32)
            layer["bn_var"] = jnp.abs(jax.random.normal(kv, (fout,), jnp.float32)) + 0.5
        params["layers"].append(layer)

    out_dim = n_target_blocks * num_unit
    for name in ("gamma", "beta"):
        key, kw, kb = jax.random.split(key, 3)
        bound = 1.0 / (last_dim ** 0.5)
        params[f"w_{name}"] = jax.random.uniform(kw, (out_dim, last_dim),
                                                 jnp.float32, -bound, bound)
        params[f"b_{name}"] = jax.random.uniform(kb, (out_dim,),
                                                 jnp.float32, -bound, bound)
    params["last_dim"] = last_dim
    return params


# ---------------------------------------------------------------------------
# One-time parameter preparation (hoisted out of the per-call hot path)
# ---------------------------------------------------------------------------
def prepare_kernel_params(params, eps=1e-5):
    """Transpose weights to (in, out), fold eval-mode BatchNorm into the next
    Linear (in f32, exact), zero-pad feature dims to 128-lane multiples, fuse
    the gamma/beta heads into one lane-dense weight/bias pair, then cast the
    weight matrices to bf16 (biases stay f32)."""
    layers = params["layers"]
    num_linear = len(layers)
    in_dim = layers[0]["w"].shape[1]

    flat = []
    pending = None          # (scale, shift) from the previous layer's BatchNorm
    prev_pad = in_dim       # padded lane width of the activation entering layer i
    max_feat_pad = in_dim
    for i, layer in enumerate(layers):
        wt = jnp.transpose(layer["w"]).astype(jnp.float32)     # (fin, fout)
        b = layer["b"].astype(jnp.float32)
        if pending is not None:
            scale, shift = pending
            b = b + shift @ wt                                 # uses unscaled wt
            wt = wt * scale[:, None]
            pending = None
        if i != 0:
            # BatchNorm1d (eval) on this layer's output -> fold into next matmul.
            scale = layer["bn_weight"] / jnp.sqrt(layer["bn_var"] + eps)
            shift = layer["bn_bias"] - layer["bn_mean"] * scale
            pending = (scale.astype(jnp.float32), shift.astype(jnp.float32))
        fin, fout = wt.shape
        out_pad = _round_up(fout, 128)
        wt_p = jnp.zeros((prev_pad, out_pad), jnp.float32).at[:fin, :fout].set(wt)
        b_p = jnp.zeros((1, out_pad), jnp.float32).at[0, :fout].set(b)
        flat += [wt_p.astype(jnp.bfloat16), b_p]
        prev_pad = out_pad
        max_feat_pad = max(max_feat_pad, out_pad)

    # Fused gamma|beta head (also absorbs the last layer's BatchNorm, if any).
    wg = jnp.transpose(params["w_gamma"]).astype(jnp.float32)  # (last_dim, out_dim)
    bg = params["b_gamma"].astype(jnp.float32)
    wb = jnp.transpose(params["w_beta"]).astype(jnp.float32)
    bb = params["b_beta"].astype(jnp.float32)
    if pending is not None:
        scale, shift = pending
        bg = bg + shift @ wg
        wg = wg * scale[:, None]
        bb = bb + shift @ wb
        wb = wb * scale[:, None]
    last_real, out_dim = wg.shape
    head_pad = _round_up(out_dim, 128)
    w_head = jnp.zeros((prev_pad, 2 * head_pad), jnp.float32)
    w_head = w_head.at[:last_real, :out_dim].set(wg)
    w_head = w_head.at[:last_real, head_pad:head_pad + out_dim].set(wb)
    b_head = jnp.zeros((1, 2 * head_pad), jnp.float32)
    b_head = b_head.at[0, :out_dim].set(bg)
    b_head = b_head.at[0, head_pad:head_pad + out_dim].set(bb)
    flat += [w_head.astype(jnp.bfloat16), b_head]
    max_feat_pad = max(max_feat_pad, 2 * head_pad)

    return {
        "kernel_inputs": [jax.device_put(a) for a in flat],
        "num_linear": num_linear,
        "in_dim": in_dim,
        "out_dim": out_dim,
        "head_pad": head_pad,
        "max_feat_pad": max_feat_pad,
    }


def _vmem_capacity_bytes():
    try:
        return int(pltpu.get_tpu_info().vmem_capacity_bytes)
    except Exception:
        return 64 << 20     # conservative: v7x per-TC physical VMEM


# ---------------------------------------------------------------------------
# Forward wrapper: call Pallas, split outputs (glue only)
# ---------------------------------------------------------------------------
def film_control_forward(x, prepared, n_blocks, internal_channels,
                         condition_to="full", batch_tile=1024):
    if condition_to not in ("full", "encoder", "decoder"):
        raise NotImplementedError

    B = x.shape[0]
    c = internal_channels
    num_linear = prepared["num_linear"]
    in_dim = prepared["in_dim"]
    out_dim = prepared["out_dim"]
    head_pad = prepared["head_pad"]
    max_feat_pad = prepared["max_feat_pad"]
    weights = prepared["kernel_inputs"]

    # bf16 operands: MXU-native on v5e/v6e/v7x; halves output writeback and
    # resident weight VMEM.  Accumulation stays f32 in-kernel.
    x = x.astype(jnp.bfloat16)

    # --- batch tiling -------------------------------------------------------
    b_pad8 = _round_up(max(B, 8), 8)   # sublane-align small batches
    if b_pad8 <= batch_tile:
        tile_b = b_pad8                # single grid step
    else:
        tile_b = batch_tile
        # Prefer >= 4 grid steps (software pipelining; megacore balance on
        # v7x's 2 TCs with the "parallel" batch axis) before maximizing the
        # tile, but never below 256 rows (HBM-roofline sweet spot).
        while tile_b > 256 and pl.cdiv(b_pad8, tile_b) < 4:
            tile_b //= 2
    pad_b = _round_up(b_pad8, tile_b)
    if pad_b != B:
        x = jnp.pad(x, ((0, pad_b - B), (0, 0)))
    grid = (pad_b // tile_b,)

    def run(single_buffer_weights):
        # x keeps its native in_dim lane width (no padded read traffic).
        in_specs = [pl.BlockSpec((tile_b, in_dim), lambda i: (i, 0))]
        for w in weights:
            if single_buffer_weights:
                # Constant index_map -> fetched once; a second buffer is waste.
                in_specs.append(pl.BlockSpec(w.shape, lambda i: (0, 0),
                                             pipeline_mode=pl.Buffered(1)))
            else:
                in_specs.append(pl.BlockSpec(w.shape, lambda i: (0, 0)))
        out_specs = pl.BlockSpec((tile_b, 2 * head_pad), lambda i: (i, 0))

        # VMEM budget: double-buffered x/out tiles, resident weights
        # (single- or double-buffered), live f32 intermediates + MXU staging.
        wbuf = 1 if single_buffer_weights else 2
        vmem_est = 2 * tile_b * in_dim * 2              # x tiles (bf16, 2 bufs)
        vmem_est += 2 * tile_b * 2 * head_pad * 2       # out tiles (bf16, 2 bufs)
        vmem_est += wbuf * sum(int(w.size) * w.dtype.itemsize for w in weights)
        vmem_est += 2 * 4 * tile_b * max_feat_pad       # f32 h intermediates
        vmem_limit = None
        if vmem_est > (16 << 20):                       # above smallest default (v5e)
            cap = int(0.78 * _vmem_capacity_bytes())    # headroom for Mosaic scratch
            vmem_limit = min(max(int(1.5 * vmem_est), 32 << 20), cap)

        return pl.pallas_call(
            _make_film_kernel(num_linear),
            out_shape=jax.ShapeDtypeStruct((pad_b, 2 * head_pad), jnp.bfloat16),
            grid_spec=pltpu.PrefetchScalarGridSpec(
                num_scalar_prefetch=0,
                grid=grid,
                in_specs=in_specs,
                out_specs=out_specs,
            ),
            compiler_params=pltpu.CompilerParams(
                dimension_semantics=("parallel",),
                vmem_limit_bytes=vmem_limit,
            ),
        )(x, *weights)

    try:
        out = run(single_buffer_weights=True)
    except Exception:
        # pl.Buffered(1) / pipeline_mode unsupported on this jax version ->
        # fall back to default double-buffered weights (correct, more VMEM).
        out = run(single_buffer_weights=False)

    gamma_flat = out[:B, :out_dim]
    beta_flat = out[:B, head_pad:head_pad + out_dim]

    # gamma_split / beta_split: chunks of width c along the last axis (glue).
    def split(t, start_idx, end_idx):
        return [t[..., layer * c:(layer + 1) * c]
                for layer in range(start_idx, end_idx)]

    m = n_blocks // 2
    if condition_to == "full":
        gammas = split(gamma_flat, 0, n_blocks)
        betas = split(beta_flat, 0, n_blocks)
        gammas = [gammas[:m], gammas[m], gammas[m + 1:]]
        betas = [betas[:m], betas[m], betas[m + 1:]]
    elif condition_to == "encoder":
        gammas = [split(gamma_flat, 0, m), None, None]
        betas = [split(beta_flat, 0, m), None, None]
    else:  # decoder
        gammas = [None, None, split(gamma_flat, 0, m)]
        betas = [None, None, split(beta_flat, 0, m)]
    return gammas, betas


# ---------------------------------------------------------------------------
# Pure-JAX f32 reference (same eval semantics) for a correctness check
# ---------------------------------------------------------------------------
def _reference_flat(x, params, eps=1e-5):
    h = x.astype(jnp.float32)
    for i, layer in enumerate(params["layers"]):
        h = h @ layer["w"].T + layer["b"]
        h = jnp.maximum(h, 0.0)
        if i != 0:
            h = (h - layer["bn_mean"]) / jnp.sqrt(layer["bn_var"] + eps)
            h = h * layer["bn_weight"] + layer["bn_bias"]
    gamma = h @ params["w_gamma"].T + params["b_gamma"]
    beta = h @ params["w_beta"].T + params["b_beta"]
    return gamma, beta


# ---------------------------------------------------------------------------
if __name__ == "__main__":
    # Small but representative config:
    #   dense_control_block(input_dim=32, num_layer=3, scale=2, scale_type='exp')
    #     -> dims [32, 64, 128], last_dim = 128
    #   film_control_model(n_blocks=6, internal_channels=16, film_type='complex',
    #                      condition_to='full') -> gamma/beta width = 6 * 16 = 96
    B = 2
    INPUT_DIM = 32
    NUM_LAYER = 3
    N_BLOCKS = 6
    C = 16                      # internal_channels; film_type='complex' -> num_unit = C
    NUM_UNIT = C

    key = jax.random.PRNGKey(0)
    key, kx, kp = jax.random.split(key, 3)
    x_condition = jax.random.normal(kx, (B, INPUT_DIM), jnp.float32)
    params = init_params(kp, INPUT_DIM, NUM_LAYER, N_BLOCKS, NUM_UNIT)

    # One-time preparation: transposes, BN folding, head fusion, lane padding,
    # bf16 weight casting.
    prepared = prepare_kernel_params(params)

    gammas, betas = film_control_forward(x_condition, prepared, N_BLOCKS, C,
                                         condition_to="full")
    jax.block_until_ready(gammas[1])

    # Basic shape checks: encoder/decoder lists of (B, C), middle (B, C).
    assert len(gammas[0]) == N_BLOCKS // 2 and len(gammas[2]) == N_BLOCKS // 2 - 1
    assert gammas[1].shape == (B, C) and betas[1].shape == (B, C)
    for g in gammas[0] + [gammas[1]] + gammas[2]:
        assert g.shape == (B, C)

    # Numerical check against the pure-JAX f32 reference (bf16 path -> relaxed tol).
    g_ref, b_ref = _reference_flat(x_condition, params)
    g_pal = jnp.concatenate(gammas[0] + [gammas[1]] + gammas[2], axis=-1)
    b_pal = jnp.concatenate(betas[0] + [betas[1]] + betas[2], axis=-1)
    assert jnp.allclose(g_pal.astype(jnp.float32), g_ref, atol=5e-2, rtol=5e-2)
    assert jnp.allclose(b_pal.astype(jnp.float32), b_ref, atol=5e-2, rtol=5e-2)

    print("KERNEL_OK")
</pallas_src>

<mosaic_0001>
module attributes {stable_mosaic.version = 11 : i64} {
  func.func @kernel(%arg0: i32, %arg1: memref<8x32xbf16, #tpu.memory_space<vmem>>, %arg2: memref<32x128xbf16, #tpu.memory_space<vmem>>, %arg3: memref<1x128xf32, #tpu.memory_space<vmem>>, %arg4: memref<128x128xbf16, #tpu.memory_space<vmem>>, %arg5: memref<1x128xf32, #tpu.memory_space<vmem>>, %arg6: memref<128x256xbf16, #tpu.memory_space<vmem>>, %arg7: memref<1x256xf32, #tpu.memory_space<vmem>>, %arg8: memref<8x256xbf16, #tpu.memory_space<vmem>>) attributes {dimension_semantics = [#tpu.dimension_semantics<parallel>], iteration_bounds = array<i64: 1>, scalar_prefetch = 0 : i64, scratch_operands = 0 : i64, tpu.core_type = #tpu.core_type<tc>, window_params = [{transform_indices = @transform_0, window_bounds = array<i64: 8, 32>}, {pipeline_mode = #tpu.pipeline_mode<synchronous>, transform_indices = @transform_1, window_bounds = array<i64: 32, 128>}, {pipeline_mode = #tpu.pipeline_mode<synchronous>, transform_indices = @transform_2, window_bounds = array<i64: 1, 128>}, {pipeline_mode = #tpu.pipeline_mode<synchronous>, transform_indices = @transform_3, window_bounds = array<i64: 128, 128>}, {pipeline_mode = #tpu.pipeline_mode<synchronous>, transform_indices = @transform_4, window_bounds = array<i64: 1, 128>}, {pipeline_mode = #tpu.pipeline_mode<synchronous>, transform_indices = @transform_5, window_bounds = array<i64: 128, 256>}, {pipeline_mode = #tpu.pipeline_mode<synchronous>, transform_indices = @transform_6, window_bounds = array<i64: 1, 256>}, {transform_indices = @transform_7, window_bounds = array<i64: 8, 256>}]} {
    %c0 = arith.constant 0 : index
    %c0_0 = arith.constant 0 : index
    %0 = vector.load %arg1[%c0, %c0_0] : memref<8x32xbf16, #tpu.memory_space<vmem>>, vector<8x32xbf16>
    %c0_1 = arith.constant 0 : index
    %c0_2 = arith.constant 0 : index
    %1 = vector.load %arg2[%c0_1, %c0_2] : memref<32x128xbf16, #tpu.memory_space<vmem>>, vector<32x128xbf16>
    %c0_3 = arith.constant 0 : index
    %c0_4 = arith.constant 0 : index
    %2 = vector.load %arg3[%c0_3, %c0_4] : memref<1x128xf32, #tpu.memory_space<vmem>>, vector<1x128xf32>
    %cst = arith.constant dense<0.000000e+00> : vector<8x128xf32>
    %3 = tpu.matmul %0, %1, %cst {dimension_numbers = #tpu.dot_dimension_numbers<[1], [0], [0], [1], [0, 0, 1, 1], [], []>} : vector<8x32xbf16>, vector<32x128xbf16>, vector<8x128xf32> -> vector<8x128xf32>
    %4 = vector.broadcast %2 : vector<1x128xf32> to vector<8x128xf32>
    %5 = arith.addf %3, %4 : vector<8x128xf32>
    %cst_5 = arith.constant 0.000000e+00 : f32
    %6 = vector.broadcast %cst_5 : f32 to vector<8x128xf32>
    %7 = arith.maximumf %5, %6 : vector<8x128xf32>
    %8 = arith.truncf %7 : vector<8x128xf32> to vector<8x128xbf16>
    %c0_6 = arith.constant 0 : index
    %c0_7 = arith.constant 0 : index
    %9 = vector.load %arg4[%c0_6, %c0_7] : memref<128x128xbf16, #tpu.memory_space<vmem>>, vector<128x128xbf16>
    %c0_8 = arith.constant 0 : index
    %c0_9 = arith.constant 0 : index
    %10 = vector.load %arg5[%c0_8, %c0_9] : memref<1x128xf32, #tpu.memory_space<vmem>>, vector<1x128xf32>
    %cst_10 = arith.constant dense<0.000000e+00> : vector<8x128xf32>
    %11 = tpu.matmul %8, %9, %cst_10 {dimension_numbers = #tpu.dot_dimension_numbers<[1], [0], [0], [1], [0, 0, 1, 1], [], []>} : vector<8x128xbf16>, vector<128x128xbf16>, vector<8x128xf32> -> vector<8x128xf32>
    %12 = vector.broadcast %10 : vector<1x128xf32> to vector<8x128xf32>
    %13 = arith.addf %11, %12 : vector<8x128xf32>
    %cst_11 = arith.constant 0.000000e+00 : f32
    %14 = vector.broadcast %cst_11 : f32 to vector<8x128xf32>
    %15 = arith.maximumf %13, %14 : vector<8x128xf32>
    %16 = arith.truncf %15 : vector<8x128xf32> to vector<8x128xbf16>
    %c0_12 = arith.constant 0 : index
    %c0_13 = arith.constant 0 : index
    %17 = vector.load %arg6[%c0_12, %c0_13] : memref<128x256xbf16, #tpu.memory_space<vmem>>, vector<128x256xbf16>
    %c0_14 = arith.constant 0 : index
    %c0_15 = arith.constant 0 : index
    %18 = vector.load %arg7[%c0_14, %c0_15] : memref<1x256xf32, #tpu.memory_space<vmem>>, vector<1x256xf32>
    %cst_16 = arith.constant dense<0.000000e+00> : vector<8x256xf32>
    %19 = tpu.matmul %16, %17, %cst_16 {dimension_numbers = #tpu.dot_dimension_numbers<[1], [0], [0], [1], [0, 0, 1, 1], [], []>} : vector<8x128xbf16>, vector<128x256xbf16>, vector<8x256xf32> -> vector<8x256xf32>
    %20 = vector.broadcast %18 : vector<1x256xf32> to vector<8x256xf32>
    %21 = arith.addf %19, %20 : vector<8x256xf32>
    %22 = arith.truncf %21 : vector<8x256xf32> to vector<8x256xbf16>
    %c0_17 = arith.constant 0 : index
    %c0_18 = arith.constant 0 : index
    %23 = vector.load %arg8[%c0_17, %c0_18] : memref<8x256xbf16, #tpu.memory_space<vmem>>, vector<8x256xbf16>
    tpu.vector_store %arg8[%c0_17, %c0_18], %22 {strides = array<i32>} : memref<8x256xbf16, #tpu.memory_space<vmem>>, vector<8x256xbf16>,
    return
  }
  func.func @transform_0(%arg0: i32) -> (i32, i32) {
    %c0_i32 = arith.constant 0 : i32
    %c0_i32_0 = arith.constant 0 : i32
    return %arg0, %c0_i32 : i32, i32
  }
  func.func @transform_1(%arg0: i32) -> (i32, i32) {
    %c0_i32 = arith.constant 0 : i32
    %c0_i32_0 = arith.constant 0 : i32
    %c0_i32_1 = arith.constant 0 : i32
    return %c0_i32, %c0_i32_0 : i32, i32
  }
  func.func @transform_2(%arg0: i32) -> (i32, i32) {
    %c0_i32 = arith.constant 0 : i32
    %c0_i32_0 = arith.constant 0 : i32
    %c0_i32_1 = arith.constant 0 : i32
    return %c0_i32, %c0_i32_0 : i32, i32
  }
  func.func @transform_3(%arg0: i32) -> (i32, i32) {
    %c0_i32 = arith.constant 0 : i32
    %c0_i32_0 = arith.constant 0 : i32
    %c0_i32_1 = arith.constant 0 : i32
    return %c0_i32, %c0_i32_0 : i32, i32
  }
  func.func @transform_4(%arg0: i32) -> (i32, i32) {
    %c0_i32 = arith.constant 0 : i32
    %c0_i32_0 = arith.constant 0 : i32
    %c0_i32_1 = arith.constant 0 : i32
    return %c0_i32, %c0_i32_0 : i32, i32
  }
  func.func @transform_5(%arg0: i32) -> (i32, i32) {
    %c0_i32 = arith.constant 0 : i32
    %c0_i32_0 = arith.constant 0 : i32
    %c0_i32_1 = arith.constant 0 : i32
    return %c0_i32, %c0_i32_0 : i32, i32
  }
  func.func @transform_6(%arg0: i32) -> (i32, i32) {
    %c0_i32 = arith.constant 0 : i32
    %c0_i32_0 = arith.constant 0 : i32
    %c0_i32_1 = arith.constant 0 : i32
    return %c0_i32, %c0_i32_0 : i32, i32
  }
  func.func @transform_7(%arg0: i32) -> (i32, i32) {
    %c0_i32 = arith.constant 0 : i32
    %c0_i32_0 = arith.constant 0 : i32
    return %arg0, %c0_i32 : i32, i32
  }
}

module attributes {stable_mosaic.version = 11 : i64} {
  func.func @kernel(%arg0: i32, %arg1: memref<8x32xbf16, #tpu.memory_space<vmem>>, %arg2: memref<32x128xbf16, #tpu.memory_space<vmem>>, %arg3: memref<1x128xf32, #tpu.memory_space<vmem>>, %arg4: memref<128x128xbf16, #tpu.memory_space<vmem>>, %arg5: memref<1x128xf32, #tpu.memory_space<vmem>>, %arg6: memref<128x256xbf16, #tpu.memory_space<vmem>>, %arg7: memref<1x256xf32, #tpu.memory_space<vmem>>, %arg8: memref<8x256xbf16, #tpu.memory_space<vmem>>) attributes {dimension_semantics = [#tpu.dimension_semantics<parallel>], iteration_bounds = array<i64: 1>, scalar_prefetch = 0 : i64, scratch_operands = 0 : i64, tpu.core_type = #tpu.core_type<tc>, window_params = [{transform_indices = @transform_0, window_bounds = array<i64: 8, 32>}, {pipeline_mode = #tpu.pipeline_mode<synchronous>, transform_indices = @transform_1, window_bounds = array<i64: 32, 128>}, {pipeline_mode = #tpu.pipeline_mode<synchronous>, transform_indices = @transform_2, window_bounds = array<i64: 1, 128>}, {pipeline_mode = #tpu.pipeline_mode<synchronous>, transform_indices = @transform_3, window_bounds = array<i64: 128, 128>}, {pipeline_mode = #tpu.pipeline_mode<synchronous>, transform_indices = @transform_4, window_bounds = array<i64: 1, 128>}, {pipeline_mode = #tpu.pipeline_mode<synchronous>, transform_indices = @transform_5, window_bounds = array<i64: 128, 256>}, {pipeline_mode = #tpu.pipeline_mode<synchronous>, transform_indices = @transform_6, window_bounds = array<i64: 1, 256>}, {transform_indices = @transform_7, window_bounds = array<i64: 8, 256>}]} {
    %c0 = arith.constant 0 : index
    %c0_0 = arith.constant 0 : index
    %0 = vector.load %arg1[%c0, %c0_0] : memref<8x32xbf16, #tpu.memory_space<vmem>>, vector<8x32xbf16>
    %c0_1 = arith.constant 0 : index
    %c0_2 = arith.constant 0 : index
    %1 = vector.load %arg2[%c0_1, %c0_2] : memref<32x128xbf16, #tpu.memory_space<vmem>>, vector<32x128xbf16>
    %c0_3 = arith.constant 0 : index
    %c0_4 = arith.constant 0 : index
    %2 = vector.load %arg3[%c0_3, %c0_4] : memref<1x128xf32, #tpu.memory_space<vmem>>, vector<1x128xf32>
    %cst = arith.constant dense<0.000000e+00> : vector<8x128xf32>
    %3 = tpu.matmul %0, %1, %cst {dimension_numbers = #tpu.dot_dimension_numbers<[1], [0], [0], [1], [0, 0, 1, 1], [], []>} : vector<8x32xbf16>, vector<32x128xbf16>, vector<8x128xf32> -> vector<8x128xf32>
    %4 = vector.broadcast %2 : vector<1x128xf32> to vector<8x128xf32>
    %5 = arith.addf %3, %4 : vector<8x128xf32>
    %cst_5 = arith.constant 0.000000e+00 : f32
    %6 = vector.broadcast %cst_5 : f32 to vector<8x128xf32>
    %7 = arith.maximumf %5, %6 : vector<8x128xf32>
    %8 = arith.truncf %7 : vector<8x128xf32> to vector<8x128xbf16>
    %c0_6 = arith.constant 0 : index
    %c0_7 = arith.constant 0 : index
    %9 = vector.load %arg4[%c0_6, %c0_7] : memref<128x128xbf16, #tpu.memory_space<vmem>>, vector<128x128xbf16>
    %c0_8 = arith.constant 0 : index
    %c0_9 = arith.constant 0 : index
    %10 = vector.load %arg5[%c0_8, %c0_9] : memref<1x128xf32, #tpu.memory_space<vmem>>, vector<1x128xf32>
    %cst_10 = arith.constant dense<0.000000e+00> : vector<8x128xf32>
    %11 = tpu.matmul %8, %9, %cst_10 {dimension_numbers = #tpu.dot_dimension_numbers<[1], [0], [0], [1], [0, 0, 1, 1], [], []>} : vector<8x128xbf16>, vector<128x128xbf16>, vector<8x128xf32> -> vector<8x128xf32>
    %12 = vector.broadcast %10 : vector<1x128xf32> to vector<8x128xf32>
    %13 = arith.addf %11, %12 : vector<8x128xf32>
    %cst_11 = arith.constant 0.000000e+00 : f32
    %14 = vector.broadcast %cst_11 : f32 to vector<8x128xf32>
    %15 = arith.maximumf %13, %14 : vector<8x128xf32>
    %16 = arith.truncf %15 : vector<8x128xf32> to vector<8x128xbf16>
    %c0_12 = arith.constant 0 : index
    %c0_13 = arith.constant 0 : index
    %17 = vector.load %arg6[%c0_12, %c0_13] : memref<128x256xbf16, #tpu.memory_space<vmem>>, vector<128x256xbf16>
    %c0_14 = arith.constant 0 : index
    %c0_15 = arith.constant 0 : index
    %18 = vector.load %arg7[%c0_14, %c0_15] : memref<1x256xf32, #tpu.memory_space<vmem>>, vector<1x256xf32>
    %cst_16 = arith.constant dense<0.000000e+00> : vector<8x256xf32>
    %19 = tpu.matmul %16, %17, %cst_16 {dimension_numbers = #tpu.dot_dimension_numbers<[1], [0], [0], [1], [0, 0, 1, 1], [], []>} : vector<8x128xbf16>, vector<128x256xbf16>, vector<8x256xf32> -> vector<8x256xf32>
    %20 = vector.broadcast %18 : vector<1x256xf32> to vector<8x256xf32>
    %21 = arith.addf %19, %20 : vector<8x256xf32>
    %22 = arith.truncf %21 : vector<8x256xf32> to vector<8x256xbf16>
    %c0_17 = arith.constant 0 : index
    %c0_18 = arith.constant 0 : index
    %23 = vector.load %arg8[%c0_17, %c0_18] : memref<8x256xbf16, #tpu.memory_space<vmem>>, vector<8x256xbf16>
    tpu.vector_store %arg8[%c0_17, %c0_18], %22 {strides = array<i32>} : memref<8x256xbf16, #tpu.memory_space<vmem>>, vector<8x256xbf16>,
    return
  }
  func.func @transform_0(%arg0: i32) -> (i32, i32) {
    %c0_i32 = arith.constant 0 : i32
    %c0_i32_0 = arith.constant 0 : i32
    return %arg0, %c0_i32 : i32, i32
  }
  func.func @transform_1(%arg0: i32) -> (i32, i32) {
    %c0_i32 = arith.constant 0 : i32
    %c0_i32_0 = arith.constant 0 : i32
    %c0_i32_1 = arith.constant 0 : i32
    return %c0_i32, %c0_i32_0 : i32, i32
  }
  func.func @transform_2(%arg0: i32) -> (i32, i32) {
    %c0_i32 = arith.constant 0 : i32
    %c0_i32_0 = arith.constant 0 : i32
    %c0_i32_1 = arith.constant 0 : i32
    return %c0_i32, %c0_i32_0 : i32, i32
  }
  func.func @transform_3(%arg0: i32) -> (i32, i32) {
    %c0_i32 = arith.constant 0 : i32
    %c0_i32_0 = arith.constant 0 : i32
    %c0_i32_1 = arith.constant 0 : i32
    return %c0_i32, %c0_i32_0 : i32, i32
  }
  func.func @transform_4(%arg0: i32) -> (i32, i32) {
    %c0_i32 = arith.constant 0 : i32
    %c0_i32_0 = arith.constant 0 : i32
    %c0_i32_1 = arith.constant 0 : i32
    return %c0_i32, %c0_i32_0 : i32, i32
  }
  func.func @transform_5(%arg0: i32) -> (i32, i32) {
    %c0_i32 = arith.constant 0 : i32
    %c0_i32_0 = arith.constant 0 : i32
    %c0_i32_1 = arith.constant 0 : i32
    return %c0_i32, %c0_i32_0 : i32, i32
  }
  func.func @transform_6(%arg0: i32) -> (i32, i32) {
    %c0_i32 = arith.constant 0 : i32
    %c0_i32_0 = arith.constant 0 : i32
    %c0_i32_1 = arith.constant 0 : i32
    return %c0_i32, %c0_i32_0 : i32, i32
  }
  func.func @transform_7(%arg0: i32) -> (i32, i32) {
    %c0_i32 = arith.constant 0 : i32
    %c0_i32_0 = arith.constant 0 : i32
    return %arg0, %c0_i32 : i32, i32
  }
}

</mosaic_0001>

<bundles_post_ra>
// kernel: tpu_custom_call.1
= control target key start
LH: loop header
LB: loop body
LE: loop exit
PB: predicated region body
PF: predicated region fallthrough
CT: control target
= control target key end

     0   :  { %12 = vsyncpa [#allocation3], 0  ;;  %s743_s0 = inlined_call_operand.hbm [shape: bf16[8,32], index: 0, kind: input, shape index: {}]   ;;  %s744_s1 = inlined_call_operand.hbm [shape: bf16[32,128], index: 1, kind: input, shape index: {}]   ;;  %s745_s2 = inlined_call_operand.vmem [shape: f32[1,128], index: 2, kind: input, shape index: {}]   ;;  %s746_s3 = inlined_call_operand.hbm [shape: bf16[128,128], index: 3, kind: input, shape index: {}]   ;;  %s747_s4 = inlined_call_operand.hbm [shape: f32[1,128], index: 4, kind: input, shape index: {}]   ;;  %s748_s5 = inlined_call_operand.hbm [shape: bf16[128,256], index: 5, kind: input, shape index: {}]   ;;  %s749_s6 = inlined_call_operand.vmem [shape: f32[1,256], index: 6, kind: input, shape index: {}]   ;;  %s750_s7 = inlined_call_operand.hbm [shape: bf16[8,256], index: 7, kind: output, shape index: {}]  }
   0x1   :  { %13 = vsyncpa [#allocation6], 0 }
   0x2   :  { %14 = vsyncpa [#allocation9], 0  ;;  %s31_s26 = sshll.u32 %s744_s1, 4  ;;  %s32_s26 = int_to_ptr.hbm [resolvable:$true] %s31_s26 }
   0x3   :  { %15 = vsyncpa [#allocation4], 0  ;;  %s669_s27 = smov [#allocation5]   ;;  %s60_s8 = sshll.u32 %s747_s4, 4  ;;  %s61_s8 = int_to_ptr.hbm [resolvable:$true] %s60_s8 }
   0x4   :  { %s33_s28 = sshll.u32 %s669_s27, 4  ;;  %s670_s9 = smov 64   ;;  %s34_s28 = int_to_ptr.vmem [resolvable:$true] %s33_s28 }
   0x5   :  { %s671_s10 = smov 4   ;;  %s672_s11 = smov [#allocation8]  }
   0x6   :  { %39 = dma.hbm_to_vmem [thread:$0]  %s32_s26, 256, %s34_s28, [#allocation6], %s670_s9, %s670_s9, %s671_s10  }
   0x7   :  { %s62_s12 = sshll.u32 %s672_s11, 4  ;;  %s21_s15 = sshll.u32 %s743_s0, 4  ;;  %s63_s12 = int_to_ptr.vmem [resolvable:$true] %s62_s12  ;;  %s22_s15 = int_to_ptr.hbm [resolvable:$true] %s21_s15 }
   0x8   :  { %65 = dma.hbm_to_vmem [thread:$0]  %s61_s8, 16, %s63_s12, [#allocation9]  }
   0x9   :  { %s46_s17 = sshll.u32 %s746_s3, 4  ;;  %s673_s18 = smov [#allocation2]   ;;  %s47_s17 = int_to_ptr.hbm [resolvable:$true] %s46_s17 }
   0xa   :  { %s23_s19 = sshll.u32 %s673_s18, 4  ;;  %s674_s4 = smov [#allocation7]   ;;  %s24_s19 = int_to_ptr.vmem [resolvable:$true] %s23_s19 }
   0xb   :  { %26 = dma.hbm_to_vmem [thread:$0]  %s22_s15, 64, %s24_s19, [#allocation3]  }
   0xc   :  { %s48_s20 = sshll.u32 %s674_s4, 4  ;;  %s70_s23 = sshll.u32 %s748_s5, 4  ;;  %s49_s20 = int_to_ptr.vmem [resolvable:$true] %s48_s20  ;;  %s71_s23 = int_to_ptr.hbm [resolvable:$true] %s70_s23 }
   0xd   :  { %54 = dma.hbm_to_vmem [thread:$0]  %s47_s17, 1024, %s49_s20, [#allocation6], %s670_s9, %s670_s9, %s671_s10  }
   0xe   :  { %s675_s0 = smov [#allocation10]   ;;  %s676_s25 = smov 128  }
   0xf   :  { %s72_s24 = sshll.u32 %s675_s0, 4  ;;  %s677_s26 = smov 8   ;;  %s73_s24 = int_to_ptr.vmem [resolvable:$true] %s72_s24 }
  0x10   :  { %78 = dma.hbm_to_vmem [thread:$0]  %s71_s23, 2048, %s73_s24, [#allocation9], %s676_s25, %s676_s25, %s677_s26  }
  0x11   :  { %661 = dma.done.wait [#allocation3], 64  }
  0x12   :  { %662 = vsyncadd [#allocation3], 4294967232 }
  0x13   :  { %663 = dma.done.wait [#allocation6], 1280  }
  0x14   :  { %664 = vsyncadd [#allocation6], 4294966016 }
  0x15   :  { %665 = dma.done.wait [#allocation9], 2064  }
  0x16   :  { %666 = vsyncadd [#allocation9], 4294965232  ;;  %v480_v0 = vld [vmem:[#allocation5 + $0x8] sm:$0xff]  ;;  %v479_v2 = vld [vmem:[#allocation5] sm:$0xff]  ;;  %vm123_vm0 = vcmask 261120   ;;  %s678_s28 = smov [#allocation11]  }
  0x17   :  { %v488_v1 = vld [vmem:[#allocation7 + $0x38] sm:$0xff]  ;;  %133 = vmatpush.bf16.msra.mxu0 %v480_v0  ;;  %v487_v3 = vld [vmem:[#allocation7 + $0x30] sm:$0xff]  ;;  %v102_v4 = vld [vmem:[#allocation2] sm:$0xf]  ;;  %s360_s29 = sshll.u32 %s678_s28, 4  ;;  %s362_s9 = sshll.u32 %s750_s7, 4  ;;  %s361_s29 = int_to_ptr.vmem [resolvable:$true] %s360_s29  ;;  %s363_s9 = int_to_ptr.hbm [resolvable:$true] %s362_s9 }
  0x18   :  { %210 = vmatpush.bf16.msra.mxu1 %v488_v1  ;;  %v486_v5 = vld [vmem:[#allocation7 + $0x28] sm:$0xff]  ;;  %v485_v6 = vld [vmem:[#allocation7 + $0x20] sm:$0xff]  ;;  %v484_v7 = vld [vmem:[#allocation7 + $0x18] sm:$0xff] }
  0x19   :  { %v483_v8 = vld [vmem:[#allocation7 + $0x10] sm:$0xff]  ;;  %v482_v9 = vld [vmem:[#allocation7 + $0x8] sm:$0xff]  ;;  %v481_v10 = vld [vmem:[#allocation7] sm:$0xff] }
  0x1a   :  { %v473_v11 = vld [vmem:[#allocation10 + $0x70] sm:$0xf]  ;;  %v504_v12 = vld [vmem:[#allocation10 + $0x74] sm:$0xf0]  ;;  %v503_v13 = vld [vmem:[#allocation10 + $0x74] sm:$0xf] }
  0x1b   :  { %134 = vmatpush.bf16.msra.mxu0 %v479_v2  ;;  %v474_v14 = vor.u32 %v504_v12, %v473_v11  ;;  %v475_v15 = vld [vmem:[#allocation10 + $0x78] sm:$0xf0]  ;;  %v465_v16 = vld [vmem:[#allocation10 + $0x60] sm:$0xf]  ;;  %v502_v17 = vld [vmem:[#allocation10 + $0x64] sm:$0xf0] }
  0x1c   :  { %211 = vmatpush.bf16.msra.mxu1 %v487_v3  ;;  %v478_v18 = vor.u32 %v503_v13, %v475_v15  ;;  %v501_v19 = vld [vmem:[#allocation10 + $0x64] sm:$0xf]  ;;  %v467_v20 = vld [vmem:[#allocation10 + $0x68] sm:$0xf0]  ;;  %v466_v21 = vor.u32 %v502_v17, %v465_v16  ;;  %v457_v23 = vld [vmem:[#allocation10 + $0x50] sm:$0xf] }
  0x1d   :  { %327 = vmatpush.bf16.msra.mxu2 %v474_v14  ;;  %v470_v22 = vor.u32 %v501_v19, %v467_v20  ;;  %v500_v24 = vld [vmem:[#allocation10 + $0x54] sm:$0xf0]  ;;  %v499_v25 = vld [vmem:[#allocation10 + $0x54] sm:$0xf]  ;;  %v459_v26 = vld [vmem:[#allocation10 + $0x58] sm:$0xf0] }
  0x1e   :  { %382 = vmatmul.msk.bf16.vlgmr.msra.gmra.mxu0 %vm123_vm0, %v102_v4  ;;  %340 = vmatpush.bf16.msra.mxu3 %v478_v18  ;;  %v458_v27 = vor.u32 %v500_v24, %v457_v23  ;;  %v462_v28 = vor.u32 %v499_v25, %v459_v26  ;;  %v449_v29 = vld [vmem:[#allocation10 + $0x40] sm:$0xf]  ;;  %v498_v30 = vld [vmem:[#allocation10 + $0x44] sm:$0xf0]  ;;  %v497_v31 = vld [vmem:[#allocation10 + $0x44] sm:$0xf] }
  0x1f   :  { %v451_v32 = vld [vmem:[#allocation10 + $0x48] sm:$0xf0]  ;;  %v450_v33 = vor.u32 %v498_v30, %v449_v29  ;;  %v441_v35 = vld [vmem:[#allocation10 + $0x30] sm:$0xf]  ;;  %v496_v36 = vld [vmem:[#allocation10 + $0x34] sm:$0xf0] }
  0x20   :  { %212 = vmatpush.bf16.msra.mxu1 %v486_v5  ;;  %v454_v34 = vor.u32 %v497_v31, %v451_v32  ;;  %v495_v37 = vld [vmem:[#allocation10 + $0x34] sm:$0xf]  ;;  %v443_v38 = vld [vmem:[#allocation10 + $0x38] sm:$0xf0]  ;;  %v442_v39 = vor.u32 %v496_v36, %v441_v35  ;;  %v433_v41 = vld [vmem:[#allocation10 + $0x20] sm:$0xf] }
  0x21   :  { %328 = vmatpush.bf16.msra.mxu2 %v466_v21  ;;  %v446_v40 = vor.u32 %v495_v37, %v443_v38  ;;  %v494_v42 = vld [vmem:[#allocation10 + $0x24] sm:$0xf0]  ;;  %v493_v43 = vld [vmem:[#allocation10 + $0x24] sm:$0xf]  ;;  %v435_v44 = vld [vmem:[#allocation10 + $0x28] sm:$0xf0] }
  0x22   :  { %341 = vmatpush.bf16.msra.mxu3 %v470_v22  ;;  %v434_v45 = vor.u32 %v494_v42, %v433_v41  ;;  %v438_v46 = vor.u32 %v493_v43, %v435_v44  ;;  %v515_v47 = vld [vmem:[%s745_s2] ss:$0 sm:$0xff]  ;;  %v425_v53 = vld [vmem:[#allocation10 + $0x10] sm:$0xf]  ;;  %v492_v54 = vld [vmem:[#allocation10 + $0x14] sm:$0xf0] }
  0x23   :  { %v491_v55 = vld [vmem:[#allocation10 + $0x14] sm:$0xf]  ;;  %v426_v56 = vor.u32 %v492_v54, %v425_v53  ;;  %v427_v57 = vld [vmem:[#allocation10 + $0x18] sm:$0xf0]  ;;  %v417_v59 = vld [vmem:[#allocation10] sm:$0xf] }
  0x24   :  { %213 = vmatpush.bf16.msra.mxu1 %v485_v6  ;;  %v430_v58 = vor.u32 %v491_v55, %v427_v57  ;;  %v490_v60 = vld [vmem:[#allocation10 + $0x4] sm:$0xf0]  ;;  %v489_v61 = vld [vmem:[#allocation10 + $0x4] sm:$0xf]  ;;  %v419_v63 = vld [vmem:[#allocation10 + $0x8] sm:$0xf0] }
  0x25   :  { %329 = vmatpush.bf16.msra.mxu2 %v458_v27  ;;  %v418_v62 = vor.u32 %v490_v60, %v417_v59  ;;  %v422_v0 = vor.u32 %v489_v61, %v419_v63  ;;  %v516_v1 = vld [vmem:[#allocation8] ss:$0 sm:$0xff] }
  0x26   :  { %342 = vmatpush.bf16.msra.mxu3 %v462_v28 }
  0x28   :  { %214 = vmatpush.bf16.msra.mxu1 %v484_v7  ;;  %v241_v7 = vld [vmem:[%s749_s6] sm:$0x3] }
  0x29   :  { %330 = vmatpush.bf16.msra.mxu2 %v450_v33 }
  0x2a   :  { %343 = vmatpush.bf16.msra.mxu3 %v454_v34 }
  0x2c   :  { %215 = vmatpush.bf16.msra.mxu1 %v483_v8  ;;  %v243_v8 = vperm.slane %v241_v7, 0 }
  0x2d   :  { %331 = vmatpush.bf16.msra.mxu2 %v442_v39 }
  0x2e   :  { %344 = vmatpush.bf16.msra.mxu3 %v446_v40 }
  0x30   :  { %216 = vmatpush.bf16.msra.mxu1 %v482_v9  ;;  %v244_v9 = vperm.slane %v241_v7, 1 }
  0x31   :  { %332 = vmatpush.bf16.msra.mxu2 %v434_v45 }
  0x32   :  { %345 = vmatpush.bf16.msra.mxu3 %v438_v46 }
  0x34   :  { %217 = vmatpush.bf16.msra.mxu1 %v481_v10 }
  0x35   :  { %333 = vmatpush.bf16.msra.mxu2 %v426_v56 }
  0x36   :  { %346 = vmatpush.bf16.msra.mxu3 %v430_v58 }
  0x39   :  { %334 = vmatpush.bf16.msra.mxu2 %v418_v62 }
  0x3a   :  { %347 = vmatpush.bf16.msra.mxu3 %v422_v0 }
  0x9b   :  { %v136_v48 = vpop.f32.mrf.mxu0 }
  0x9c   :  { %v137_v49 = vadd.f32 %v515_v47, %v136_v48 }
  0x9e   :  { %v140_v50 = vmax.f32 %v137_v49, 0.0 }
  0xa0   :  { %v141_v51 = vpack.c.bf16 %v140_v50, %v140_v50 }
  0xa2   :  { %218 = vmatmul.bf16.vlgmr.msra.gmra.mxu1 %v141_v51 }
  0xa3   :  { %v138_v52 = vpop.f32.mrf.mxu0 }
 0x11f   :  { %v219_v2 = vpop.f32.mrf.mxu1 }
 0x120   :  { %v220_v3 = vadd.f32 %v516_v1, %v219_v2 }
 0x122   :  { %v223_v4 = vmax.f32 %v220_v3, 0.0 }
 0x124   :  { %v224_v5 = vpack.c.bf16 %v223_v4, %v223_v4 }
 0x126   :  { %335 = vmatmul.bf16.vlgmr.msra.gmra.mxu2 %v224_v5  ;;  %348 = vmatmul.bf16.vlgmr.msra.gmra.mxu3 %v224_v5 }
 0x127   :  { %v221_v6 = vpop.f32.mrf.mxu1 }
 0x1a9   :  { %v336_v10 = vpop.f32.mrf.mxu2  ;;  %v349_v11 = vpop.f32.mrf.mxu3 }
 0x1aa   :  { %v337_v12 = vadd.f32 %v336_v10, %v243_v8  ;;  %v350_v13 = vadd.f32 %v349_v11, %v244_v9 }
 0x1ac   :  { %v353_v14 = vpack.c.bf16 %v350_v13, %v337_v12 }
 0x1ae   :  { %354 = vst [vmem:[#allocation11] sm:$0xff] %v353_v14 }
 0x1af   :  { %365 = dma.vmem_to_hbm [thread:$0]  %s361_s29, 128, %s363_s9, [#allocation4]  }
 0x1b1   :  { %v338_v15 = vpop.f32.mrf.mxu2  ;;  %v351_v16 = vpop.f32.mrf.mxu3 }
 0x1b2   :  { %667 = dma.done.wait [#allocation4], 128  }
 0x1b3   :  { %668 = vsyncadd [#allocation4], 4294967168 }
 0x1b4   :  { %370 = vsyncpa [#allocation3], 1 }
 0x1b5   :  { %371 = vsyncpa [#allocation6], 1 }
 0x1b6   :  { %372 = vsyncpa [#allocation9], 1 }
 0x1b7   :  { %373 = vsyncpa [#allocation4], 1 }

// kernel: tpu_custom_call.1
= control target key start
LH: loop header
LB: loop body
LE: loop exit
PB: predicated region body
PF: predicated region fallthrough
CT: control target
= control target key end

     0   :  { %12 = vsyncpa [#allocation3], 0  ;;  %s743_s0 = inlined_call_operand.hbm [shape: bf16[8,32], index: 0, kind: input, shape index: {}]   ;;  %s744_s1 = inlined_call_operand.hbm [shape: bf16[32,128], index: 1, kind: input, shape index: {}]   ;;  %s745_s2 = inlined_call_operand.vmem [shape: f32[1,128], index: 2, kind: input, shape index: {}]   ;;  %s746_s3 = inlined_call_operand.hbm [shape: bf16[128,128], index: 3, kind: input, shape index: {}]   ;;  %s747_s4 = inlined_call_operand.hbm [shape: f32[1,128], index: 4, kind: input, shape index: {}]   ;;  %s748_s5 = inlined_call_operand.hbm [shape: bf16[128,256], index: 5, kind: input, shape index: {}]   ;;  %s749_s6 = inlined_call_operand.vmem [shape: f32[1,256], index: 6, kind: input, shape index: {}]   ;;  %s750_s7 = inlined_call_operand.hbm [shape: bf16[8,256], index: 7, kind: output, shape index: {}]  }
   0x1   :  { %13 = vsyncpa [#allocation6], 0 }
   0x2   :  { %14 = vsyncpa [#allocation9], 0  ;;  %s31_s26 = sshll.u32 %s744_s1, 4  ;;  %s32_s26 = int_to_ptr.hbm [resolvable:$true] %s31_s26 }
   0x3   :  { %15 = vsyncpa [#allocation4], 0  ;;  %s669_s27 = smov [#allocation5]   ;;  %s60_s8 = sshll.u32 %s747_s4, 4  ;;  %s61_s8 = int_to_ptr.hbm [resolvable:$true] %s60_s8 }
   0x4   :  { %s33_s28 = sshll.u32 %s669_s27, 4  ;;  %s670_s9 = smov 64   ;;  %s34_s28 = int_to_ptr.vmem [resolvable:$true] %s33_s28 }
   0x5   :  { %s671_s10 = smov 4   ;;  %s672_s11 = smov [#allocation8]  }
   0x6   :  { %39 = dma.hbm_to_vmem [thread:$0]  %s32_s26, 256, %s34_s28, [#allocation6], %s670_s9, %s670_s9, %s671_s10  }
   0x7   :  { %s62_s12 = sshll.u32 %s672_s11, 4  ;;  %s21_s15 = sshll.u32 %s743_s0, 4  ;;  %s63_s12 = int_to_ptr.vmem [resolvable:$true] %s62_s12  ;;  %s22_s15 = int_to_ptr.hbm [resolvable:$true] %s21_s15 }
   0x8   :  { %65 = dma.hbm_to_vmem [thread:$0]  %s61_s8, 16, %s63_s12, [#allocation9]  }
   0x9   :  { %s46_s17 = sshll.u32 %s746_s3, 4  ;;  %s673_s18 = smov [#allocation2]   ;;  %s47_s17 = int_to_ptr.hbm [resolvable:$true] %s46_s17 }
   0xa   :  { %s23_s19 = sshll.u32 %s673_s18, 4  ;;  %s674_s4 = smov [#allocation7]   ;;  %s24_s19 = int_to_ptr.vmem [resolvable:$true] %s23_s19 }
   0xb   :  { %26 = dma.hbm_to_vmem [thread:$0]  %s22_s15, 64, %s24_s19, [#allocation3]  }
   0xc   :  { %s48_s20 = sshll.u32 %s674_s4, 4  ;;  %s70_s23 = sshll.u32 %s748_s5, 4  ;;  %s49_s20 = int_to_ptr.vmem [resolvable:$true] %s48_s20  ;;  %s71_s23 = int_to_ptr.hbm [resolvable:$true] %s70_s23 }
   0xd   :  { %54 = dma.hbm_to_vmem [thread:$0]  %s47_s17, 1024, %s49_s20, [#allocation6], %s670_s9, %s670_s9, %s671_s10  }
   0xe   :  { %s675_s0 = smov [#allocation10]   ;;  %s676_s25 = smov 128  }
   0xf   :  { %s72_s24 = sshll.u32 %s675_s0, 4  ;;  %s677_s26 = smov 8   ;;  %s73_s24 = int_to_ptr.vmem [resolvable:$true] %s72_s24 }
  0x10   :  { %78 = dma.hbm_to_vmem [thread:$0]  %s71_s23, 2048, %s73_s24, [#allocation9], %s676_s25, %s676_s25, %s677_s26  }
  0x11   :  { %661 = dma.done.wait [#allocation3], 64  }
  0x12   :  { %662 = vsyncadd [#allocation3], 4294967232 }
  0x13   :  { %663 = dma.done.wait [#allocation6], 1280  }
  0x14   :  { %664 = vsyncadd [#allocation6], 4294966016 }
  0x15   :  { %665 = dma.done.wait [#allocation9], 2064  }
  0x16   :  { %666 = vsyncadd [#allocation9], 4294965232  ;;  %v480_v0 = vld [vmem:[#allocation5 + $0x8] sm:$0xff]  ;;  %v479_v2 = vld [vmem:[#allocation5] sm:$0xff]  ;;  %vm123_vm0 = vcmask 261120   ;;  %s678_s28 = smov [#allocation11]  }
  0x17   :  { %v488_v1 = vld [vmem:[#allocation7 + $0x38] sm:$0xff]  ;;  %133 = vmatpush.bf16.msra.mxu0 %v480_v0  ;;  %v487_v3 = vld [vmem:[#allocation7 + $0x30] sm:$0xff]  ;;  %v102_v4 = vld [vmem:[#allocation2] sm:$0xf]  ;;  %s360_s29 = sshll.u32 %s678_s28, 4  ;;  %s362_s9 = sshll.u32 %s750_s7, 4  ;;  %s361_s29 = int_to_ptr.vmem [resolvable:$true] %s360_s29  ;;  %s363_s9 = int_to_ptr.hbm [resolvable:$true] %s362_s9 }
  0x18   :  { %210 = vmatpush.bf16.msra.mxu1 %v488_v1  ;;  %v486_v5 = vld [vmem:[#allocation7 + $0x28] sm:$0xff]  ;;  %v485_v6 = vld [vmem:[#allocation7 + $0x20] sm:$0xff]  ;;  %v484_v7 = vld [vmem:[#allocation7 + $0x18] sm:$0xff] }
  0x19   :  { %v483_v8 = vld [vmem:[#allocation7 + $0x10] sm:$0xff]  ;;  %v482_v9 = vld [vmem:[#allocation7 + $0x8] sm:$0xff]  ;;  %v481_v10 = vld [vmem:[#allocation7] sm:$0xff] }
  0x1a   :  { %v473_v11 = vld [vmem:[#allocation10 + $0x70] sm:$0xf]  ;;  %v504_v12 = vld [vmem:[#allocation10 + $0x74] sm:$0xf0]  ;;  %v503_v13 = vld [vmem:[#allocation10 + $0x74] sm:$0xf] }
  0x1b   :  { %134 = vmatpush.bf16.msra.mxu0 %v479_v2  ;;  %v474_v14 = vor.u32 %v504_v12, %v473_v11  ;;  %v475_v15 = vld [vmem:[#allocation10 + $0x78] sm:$0xf0]  ;;  %v465_v16 = vld [vmem:[#allocation10 + $0x60] sm:$0xf]  ;;  %v502_v17 = vld [vmem:[#allocation10 + $0x64] sm:$0xf0] }
  0x1c   :  { %211 = vmatpush.bf16.msra.mxu1 %v487_v3  ;;  %v478_v18 = vor.u32 %v503_v13, %v475_v15  ;;  %v501_v19 = vld [vmem:[#allocation10 + $0x64] sm:$0xf]  ;;  %v467_v20 = vld [vmem:[#allocation10 + $0x68] sm:$0xf0]  ;;  %v466_v21 = vor.u32 %v502_v17, %v465_v16  ;;  %v457_v23 = vld [vmem:[#allocation10 + $0x50] sm:$0xf] }
  0x1d   :  { %327 = vmatpush.bf16.msra.mxu2 %v474_v14  ;;  %v470_v22 = vor.u32 %v501_v19, %v467_v20  ;;  %v500_v24 = vld [vmem:[#allocation10 + $0x54] sm:$0xf0]  ;;  %v499_v25 = vld [vmem:[#allocation10 + $0x54] sm:$0xf]  ;;  %v459_v26 = vld [vmem:[#allocation10 + $0x58] sm:$0xf0] }
  0x1e   :  { %382 = vmatmul.msk.bf16.vlgmr.msra.gmra.mxu0 %vm123_vm0, %v102_v4  ;;  %340 = vmatpush.bf16.msra.mxu3 %v478_v18  ;;  %v458_v27 = vor.u32 %v500_v24, %v457_v23  ;;  %v462_v28 = vor.u32 %v499_v25, %v459_v26  ;;  %v449_v29 = vld [vmem:[#allocation10 + $0x40] sm:$0xf]  ;;  %v498_v30 = vld [vmem:[#allocation10 + $0x44] sm:$0xf0]  ;;  %v497_v31 = vld [vmem:[#allocation10 + $0x44] sm:$0xf] }
  0x1f   :  { %v451_v32 = vld [vmem:[#allocation10 + $0x48] sm:$0xf0]  ;;  %v450_v33 = vor.u32 %v498_v30, %v449_v29  ;;  %v441_v35 = vld [vmem:[#allocation10 + $0x30] sm:$0xf]  ;;  %v496_v36 = vld [vmem:[#allocation10 + $0x34] sm:$0xf0] }
  0x20   :  { %212 = vmatpush.bf16.msra.mxu1 %v486_v5  ;;  %v454_v34 = vor.u32 %v497_v31, %v451_v32  ;;  %v495_v37 = vld [vmem:[#allocation10 + $0x34] sm:$0xf]  ;;  %v443_v38 = vld [vmem:[#allocation10 + $0x38] sm:$0xf0]  ;;  %v442_v39 = vor.u32 %v496_v36, %v441_v35  ;;  %v433_v41 = vld [vmem:[#allocation10 + $0x20] sm:$0xf] }
  0x21   :  { %328 = vmatpush.bf16.msra.mxu2 %v466_v21  ;;  %v446_v40 = vor.u32 %v495_v37, %v443_v38  ;;  %v494_v42 = vld [vmem:[#allocation10 + $0x24] sm:$0xf0]  ;;  %v493_v43 = vld [vmem:[#allocation10 + $0x24] sm:$0xf]  ;;  %v435_v44 = vld [vmem:[#allocation10 + $0x28] sm:$0xf0] }
  0x22   :  { %341 = vmatpush.bf16.msra.mxu3 %v470_v22  ;;  %v434_v45 = vor.u32 %v494_v42, %v433_v41  ;;  %v438_v46 = vor.u32 %v493_v43, %v435_v44  ;;  %v515_v47 = vld [vmem:[%s745_s2] ss:$0 sm:$0xff]  ;;  %v425_v53 = vld [vmem:[#allocation10 + $0x10] sm:$0xf]  ;;  %v492_v54 = vld [vmem:[#allocation10 + $0x14] sm:$0xf0] }
  0x23   :  { %v491_v55 = vld [vmem:[#allocation10 + $0x14] sm:$0xf]  ;;  %v426_v56 = vor.u32 %v492_v54, %v425_v53  ;;  %v427_v57 = vld [vmem:[#allocation10 + $0x18] sm:$0xf0]  ;;  %v417_v59 = vld [vmem:[#allocation10] sm:$0xf] }
  0x24   :  { %213 = vmatpush.bf16.msra.mxu1 %v485_v6  ;;  %v430_v58 = vor.u32 %v491_v55, %v427_v57  ;;  %v490_v60 = vld [vmem:[#allocation10 + $0x4] sm:$0xf0]  ;;  %v489_v61 = vld [vmem:[#allocation10 + $0x4] sm:$0xf]  ;;  %v419_v63 = vld [vmem:[#allocation10 + $0x8] sm:$0xf0] }
  0x25   :  { %329 = vmatpush.bf16.msra.mxu2 %v458_v27  ;;  %v418_v62 = vor.u32 %v490_v60, %v417_v59  ;;  %v422_v0 = vor.u32 %v489_v61, %v419_v63  ;;  %v516_v1 = vld [vmem:[#allocation8] ss:$0 sm:$0xff] }
  0x26   :  { %342 = vmatpush.bf16.msra.mxu3 %v462_v28 }
  0x28   :  { %214 = vmatpush.bf16.msra.mxu1 %v484_v7  ;;  %v241_v7 = vld [vmem:[%s749_s6] sm:$0x3] }
  0x29   :  { %330 = vmatpush.bf16.msra.mxu2 %v450_v33 }
  0x2a   :  { %343 = vmatpush.bf16.msra.mxu3 %v454_v34 }
  0x2c   :  { %215 = vmatpush.bf16.msra.mxu1 %v483_v8  ;;  %v243_v8 = vperm.slane %v241_v7, 0 }
  0x2d   :  { %331 = vmatpush.bf16.msra.mxu2 %v442_v39 }
  0x2e   :  { %344 = vmatpush.bf16.msra.mxu3 %v446_v40 }
  0x30   :  { %216 = vmatpush.bf16.msra.mxu1 %v482_v9  ;;  %v244_v9 = vperm.slane %v241_v7, 1 }
  0x31   :  { %332 = vmatpush.bf16.msra.mxu2 %v434_v45 }
  0x32   :  { %345 = vmatpush.bf16.msra.mxu3 %v438_v46 }
  0x34   :  { %217 = vmatpush.bf16.msra.mxu1 %v481_v10 }
  0x35   :  { %333 = vmatpush.bf16.msra.mxu2 %v426_v56 }
  0x36   :  { %346 = vmatpush.bf16.msra.mxu3 %v430_v58 }
  0x39   :  { %334 = vmatpush.bf16.msra.mxu2 %v418_v62 }
  0x3a   :  { %347 = vmatpush.bf16.msra.mxu3 %v422_v0 }
  0x9b   :  { %v136_v48 = vpop.f32.mrf.mxu0 }
  0x9c   :  { %v137_v49 = vadd.f32 %v515_v47, %v136_v48 }
  0x9e   :  { %v140_v50 = vmax.f32 %v137_v49, 0.0 }
  0xa0   :  { %v141_v51 = vpack.c.bf16 %v140_v50, %v140_v50 }
  0xa2   :  { %218 = vmatmul.bf16.vlgmr.msra.gmra.mxu1 %v141_v51 }
  0xa3   :  { %v138_v52 = vpop.f32.mrf.mxu0 }
 0x11f   :  { %v219_v2 = vpop.f32.mrf.mxu1 }
 0x120   :  { %v220_v3 = vadd.f32 %v516_v1, %v219_v2 }
 0x122   :  { %v223_v4 = vmax.f32 %v220_v3, 0.0 }
 0x124   :  { %v224_v5 = vpack.c.bf16 %v223_v4, %v223_v4 }
 0x126   :  { %335 = vmatmul.bf16.vlgmr.msra.gmra.mxu2 %v224_v5  ;;  %348 = vmatmul.bf16.vlgmr.msra.gmra.mxu3 %v224_v5 }
 0x127   :  { %v221_v6 = vpop.f32.mrf.mxu1 }
 0x1a9   :  { %v336_v10 = vpop.f32.mrf.mxu2  ;;  %v349_v11 = vpop.f32.mrf.mxu3 }
 0x1aa   :  { %v337_v12 = vadd.f32 %v336_v10, %v243_v8  ;;  %v350_v13 = vadd.f32 %v349_v11, %v244_v9 }
 0x1ac   :  { %v353_v14 = vpack.c.bf16 %v350_v13, %v337_v12 }
 0x1ae   :  { %354 = vst [vmem:[#allocation11] sm:$0xff] %v353_v14 }
 0x1af   :  { %365 = dma.vmem_to_hbm [thread:$0]  %s361_s29, 128, %s363_s9, [#allocation4]  }
 0x1b1   :  { %v338_v15 = vpop.f32.mrf.mxu2  ;;  %v351_v16 = vpop.f32.mrf.mxu3 }
 0x1b2   :  { %667 = dma.done.wait [#allocation4], 128  }
 0x1b3   :  { %668 = vsyncadd [#allocation4], 4294967168 }
 0x1b4   :  { %370 = vsyncpa [#allocation3], 1 }
 0x1b5   :  { %371 = vsyncpa [#allocation6], 1 }
 0x1b6   :  { %372 = vsyncpa [#allocation9], 1 }
 0x1b7   :  { %373 = vsyncpa [#allocation4], 1 }

</bundles_post_ra>
